<compile_context>
chip_gen: v7x
topology: tpu7x:2x2x1
jax: 0.10.0
libtpu: 0.0.40
codegen_flags: <defaults>
</compile_context>

<pallas_src>
import functools

import jax
import jax.numpy as jnp
from jax.experimental import pallas as pl
from jax.experimental.pallas import tpu as pltpu


def _attention_kernel(params_ref, x_ref, o_ref, *, inv_spatial, mul_in_f32):
    # x_ref: (TN, S) tile in VMEM, one row per (b, c) feature map.  S is the
    # full logical spatial size, so the axis=-1 reduction is exact (Mosaic
    # masks any physical lane padding to the logical shape).
    x = x_ref[...]                                            # native dtype
    xf = x.astype(jnp.float32)
    # AdaptiveAvgPool2d(1) == mean over all spatial positions of each row.
    mean = jnp.sum(xf, axis=-1, keepdims=True) * inv_spatial  # (TN, 1) f32
    # 1x1 conv with 1 in / 1 out channel on a 1x1 map == scalar affine.
    w = params_ref[0]
    b = params_ref[1]
    gate = jax.nn.sigmoid(w * mean + b)                       # (TN, 1) f32
    if mul_in_f32:
        # v5e bf16 path: VPU has no bf16 ALUs, reuse the f32 copy.
        o_ref[...] = (xf * gate).astype(o_ref.dtype)
    else:
        # v6e/v7x (and f32 everywhere): multiply in the input dtype.
        o_ref[...] = (x * gate.astype(x.dtype)).astype(o_ref.dtype)


def _round_up(v, m):
    return (v + m - 1) // m * m


def _is_v5e():
    try:
        kind = jax.devices()[0].device_kind.lower()
    except Exception:
        return False
    return ("v5 lite" in kind) or ("v5e" in kind) or ("v5litepod" in kind)


def _choose_row_tile(N, S, itemsize, target_bytes=4 << 20):
    """Rows per grid step: multiple of 8, ~2-8 MiB tile, prefers a divisor of N,
    and keeps >= 2 grid steps when possible (v7x megacore sharding)."""
    tn = max(8, (target_bytes // max(1, S * itemsize)) // 8 * 8)
    tn = min(tn, _round_up(max(N, 1), 8))
    if tn >= N and N > 8:
        # Split so the "parallel" grid axis has >= 2 steps (both v7x TCs stream).
        tn = max(8, _round_up(pl.cdiv(N, 2), 8))
    if N % 8 == 0 and N % tn != 0:
        # Prefer an exact divisor of N -> no partial trailing block at all.
        d = tn
        while d >= 8:
            if N % d == 0:
                tn = d
                break
            d -= 8
    return tn


def attention_forward(x, conv_weight, conv_bias, *, donate_input=False):
    """x: (B, C, W, H). conv_weight / conv_bias: scalar nn.Conv2d(1,1,1) params."""
    B, C, W, H = x.shape
    N, S = B * C, W * H
    xr = x.reshape(N, S)  # contiguous relabeling, no HBM copy
    itemsize = jnp.dtype(x.dtype).itemsize

    # TODO(synk): for extremely large spatial maps (S*itemsize >> 8 MiB/row) the
    # spatial axis would need its own tiling + accumulator pass; not needed here.
    tn = _choose_row_tile(N, S, itemsize)
    grid = (pl.cdiv(N, tn),)

    # Single SMEM (2,) array holding [weight, bias].
    params = jnp.stack([
        jnp.asarray(conv_weight, jnp.float32).reshape(()),
        jnp.asarray(conv_bias, jnp.float32).reshape(()),
    ])

    # Pipelined footprint ~ 4 * tile_bytes (2 in + 2 out double-buffered).
    # >= 32 MiB is load-bearing on v5e (16 MiB scoped default); cap at 48 MiB to
    # leave headroom under v7x's 64 MiB physical per-TC VMEM.
    tile_bytes = tn * S * itemsize
    vmem_limit = int(min(48 << 20, max(32 << 20, 6 * tile_bytes)))

    mul_in_f32 = (x.dtype == jnp.bfloat16) and _is_v5e()
    kernel = functools.partial(
        _attention_kernel, inv_spatial=1.0 / float(S), mul_in_f32=mul_in_f32)

    out_flat = pl.pallas_call(
        kernel,
        out_shape=jax.ShapeDtypeStruct((N, S), x.dtype),
        grid=grid,
        in_specs=[
            pl.BlockSpec(memory_space=pltpu.MemorySpace.SMEM),  # [w, b]
            pl.BlockSpec((tn, S), lambda i: (i, 0)),            # row tile
        ],
        out_specs=pl.BlockSpec((tn, S), lambda i: (i, 0)),
        compiler_params=pltpu.CompilerParams(
            dimension_semantics=("parallel",),
            vmem_limit_bytes=vmem_limit,
        ),
        cost_estimate=pl.CostEstimate(
            flops=3 * N * S,
            transcendentals=N,
            bytes_accessed=2 * N * S * itemsize,
        ),
        # Optional: alias x's buffer as the output when the caller no longer
        # needs x (saves an output allocation / XLA copy in larger graphs).
        input_output_aliases=({1: 0} if donate_input else {}),
    )(params, xr)

    # PyTorch: reshape(-1,1,h,w) -> per-(b,c) scale -> reshape(b,-1,w,h).
    # The gate is constant per row, so the flatten/reshape is a pure relabeling.
    return out_flat.reshape(B, C, W, H)


def _reference(x, conv_weight, conv_bias):
    # Pure-JAX mirror of the PyTorch forward for verification.
    B, C, W, H = x.shape
    xr = x.reshape(B * C, 1, H, W)
    xn = jnp.mean(xr, axis=(2, 3), keepdims=True)
    xn_ = conv_weight * xn + conv_bias
    out = xr * jax.nn.sigmoid(xn_)
    return out.reshape(B, C, W, H)


if __name__ == "__main__":
    key = jax.random.PRNGKey(0)
    k_x, k_w, k_b = jax.random.split(key, 3)

    B, C, W, H = 2, 4, 16, 16
    x = jax.random.normal(k_x, (B, C, W, H), dtype=jnp.float32)

    # Deterministic stand-ins for nn.Conv2d(1,1,1) parameters
    # (weight shape (1,1,1,1), bias shape (1,) -> just two scalars).
    conv_weight = jax.random.normal(k_w, ()) * 0.5
    conv_bias = jax.random.normal(k_b, ()) * 0.1

    out = attention_forward(x, conv_weight, conv_bias)
    out = jax.block_until_ready(out)

    ref = _reference(x, conv_weight, conv_bias)
    assert out.shape == (B, C, W, H)
    assert jnp.allclose(out, ref, atol=1e-5, rtol=1e-5), "mismatch vs reference"

    print("KERNEL_OK")
</pallas_src>

<mosaic_0001>
module attributes {stable_mosaic.version = 11 : i64} {
  func.func @_attention_kernel(%arg0: i32, %arg1: memref<2xf32, #tpu.memory_space<smem>>, %arg2: memref<8x256xf32, #tpu.memory_space<vmem>>, %arg3: memref<8x256xf32, #tpu.memory_space<vmem>>) attributes {dimension_semantics = [#tpu.dimension_semantics<parallel>], iteration_bounds = array<i64: 1>, scalar_prefetch = 0 : i64, scratch_operands = 0 : i64, tpu.core_type = #tpu.core_type<tc>, window_params = [{transform_indices = @transform_0, window_bounds = array<i64: 2>}, {transform_indices = @transform_1, window_bounds = array<i64: 8, 256>}, {transform_indices = @transform_2, window_bounds = array<i64: 8, 256>}]} {
    %c0 = arith.constant 0 : index
    %c0_0 = arith.constant 0 : index
    %0 = vector.load %arg2[%c0, %c0_0] : memref<8x256xf32, #tpu.memory_space<vmem>>, vector<8x256xf32>
    %cst = arith.constant dense<0.000000e+00> : vector<8xf32>
    %1 = vector.multi_reduction <add>, %0, %cst [1] : vector<8x256xf32> to vector<8xf32>
    %2 = vector.shape_cast %1 : vector<8xf32> to vector<8x1xf32>
    %cst_1 = arith.constant 3.906250e-03 : f32
    %3 = vector.broadcast %cst_1 : f32 to vector<8x1xf32>
    %4 = arith.mulf %2, %3 : vector<8x1xf32>
    %c0_2 = arith.constant 0 : index
    %5 = memref.load %arg1[%c0_2] : memref<2xf32, #tpu.memory_space<smem>>
    %c1 = arith.constant 1 : index
    %6 = memref.load %arg1[%c1] : memref<2xf32, #tpu.memory_space<smem>>
    %7 = vector.broadcast %5 : f32 to vector<8x1xf32>
    %8 = arith.mulf %7, %4 : vector<8x1xf32>
    %9 = vector.broadcast %6 : f32 to vector<8x1xf32>
    %10 = arith.addf %8, %9 : vector<8x1xf32>
    %11 = arith.negf %10 : vector<8x1xf32>
    %12 = math.exp %11 : vector<8x1xf32>
    %cst_3 = arith.constant 1.000000e+00 : f32
    %13 = vector.broadcast %cst_3 : f32 to vector<8x1xf32>
    %14 = arith.addf %13, %12 : vector<8x1xf32>
    %15 = arith.divf %13, %14 : vector<8x1xf32>
    %16 = vector.broadcast %15 : vector<8x1xf32> to vector<8x256xf32>
    %17 = arith.mulf %0, %16 : vector<8x256xf32>
    %c0_4 = arith.constant 0 : index
    %c0_5 = arith.constant 0 : index
    %18 = vector.load %arg3[%c0_4, %c0_5] : memref<8x256xf32, #tpu.memory_space<vmem>>, vector<8x256xf32>
    tpu.vector_store %arg3[%c0_4, %c0_5], %17 {strides = array<i32>} : memref<8x256xf32, #tpu.memory_space<vmem>>, vector<8x256xf32>,
    return
  }
  func.func @transform_0(%arg0: i32) -> i32 {
    %c0_i32 = arith.constant 0 : i32
    %c0_i32_0 = arith.constant 0 : i32
    return %c0_i32 : i32
  }
  func.func @transform_1(%arg0: i32) -> (i32, i32) {
    %c0_i32 = arith.constant 0 : i32
    %c0_i32_0 = arith.constant 0 : i32
    return %arg0, %c0_i32 : i32, i32
  }
  func.func @transform_2(%arg0: i32) -> (i32, i32) {
    %c0_i32 = arith.constant 0 : i32
    %c0_i32_0 = arith.constant 0 : i32
    return %arg0, %c0_i32 : i32, i32
  }
}

</mosaic_0001>

<bundles_post_ra>
// kernel: tpu_custom_call.1
= control target key start
LH: loop header
LB: loop body
LE: loop exit
PB: predicated region body
PF: predicated region fallthrough
CT: control target
= control target key end

     0   :  { %7 = vsyncpa [#allocation5], 0  ;;  %s196_s0 = inlined_call_operand.hbm [shape: f32[2], index: 0, kind: input, shape index: {}]   ;;  %s197_s1 = inlined_call_operand.hbm [shape: f32[8,256], index: 1, kind: input, shape index: {}]   ;;  %s198_s2 = inlined_call_operand.hbm [shape: f32[8,256], index: 2, kind: output, shape index: {}]  }
   0x1   :  { %8 = vsyncpa [#allocation3], 0 }
   0x2   :  { %9 = vsyncpa [#allocation4], 0  ;;  %s82_s11 = scalar_lea.hbm %s196_s0, 16 }
   0x3   :  { %p83_p0 = scmp.ne.s32.totalorder %s196_s0, %s82_s11  ;;  %p86_p1 = scmp.lt.u32.totalorder %s82_s11, %s196_s0 }
   0x5   :  { %p88_p2 = pnand %p86_p1, %p83_p0 }
   0x7   :  { %91 = shalt.err (!%p88_p2)
}
   0x8   :  { %s142_s16 = smov [#allocation2]   ;;  %s143_s19 = smov [#allocation6]  }
   0x9   :  { %17 = dma.hbm_to_smem %s196_s0, 16, %s142_s16, [#allocation5]  }
   0xa   :  { %s24_s20 = sshll.u32 %s143_s19, 4  ;;  %s92_s23 = scalar_lea.hbm %s197_s1, 256  ;;  %s25_s20 = int_to_ptr.vmem [resolvable:$true] %s24_s20 }
   0xb   :  { %p93_p3 = scmp.ne.s32.totalorder %s197_s1, %s92_s23  ;;  %p96_p4 = scmp.lt.u32.totalorder %s92_s23, %s197_s1 }
   0xd   :  { %p98_p5 = pnand %p96_p4, %p93_p3 }
   0xf   :  { %101 = shalt.err (!%p98_p5)
}
  0x10   :  { %s102_s28 = scalar_lea.vmem %s25_s20, 256  ;;  %p107_p7 = scmp.lt.s32.totalorder %s25_s20, %s25_s20 }
  0x11   :  { %p103_p6 = scmp.ne.s32.totalorder %s25_s20, %s102_s28  ;;  %p108_p8 = scmp.lt.s32.totalorder %s102_s28, %s102_s28 }
  0x13   :  { %p109_p9 = por %p108_p8, %p107_p7 }
  0x15   :  { %p110_p10 = pnand %p109_p9, %p103_p6 }
  0x17   :  { %113 = shalt.err (!%p110_p10)
}
  0x18   :  { %27 = dma.hbm_to_vmem [thread:$0]  %s197_s1, 256, %s25_s20, [#allocation3]  }
  0x19   :  { %136 = dma.done.wait [#allocation5], 16  }
  0x1a   :  { %137 = vsyncadd [#allocation5], 4294967280 }
  0x1b   :  { %138 = dma.done.wait [#allocation3], 256  }
  0x1c   :  { %139 = vsyncadd [#allocation3], 4294967040 }
  0x1d   :  { %34 = sfence }
  0x1e   :  { %v35_v0 = vld [vmem:[#allocation6] sm:$0xff]  ;;  %v36_v1 = vld [vmem:[#allocation6 + $0x8] sm:$0xff]  ;;  %s41_s30 = sld [smem:[#allocation2]]  ;;  %s73_s3 = sld [smem:[#allocation2 + $0x1]] }
  0x1f   :  { %v37_v2 = vadd.f32 %v36_v1, %v35_v0  ;;  %s144_s1 = smov [#allocation7]  }
  0x20   :  { %s63_s4 = sshll.u32 %s144_s1, 4  ;;  %s64_s4 = int_to_ptr.vmem [resolvable:$true] %s63_s4 }
  0x21   :  { %38 = vadd.xlane.f32.xlu0 %v37_v2  ;;  %s114_s5 = scalar_lea.vmem %s64_s4, 256  ;;  %p119_p12 = scmp.lt.s32.totalorder %s64_s4, %s64_s4 }
  0x22   :  { %p115_p11 = scmp.ne.s32.totalorder %s64_s4, %s114_s5  ;;  %p120_p13 = scmp.lt.s32.totalorder %s114_s5, %s114_s5 }
  0x24   :  { %v43_v4 = vstv %s41_s30  ;;  %v45_v6 = vstv %s73_s3  ;;  %p121_p0 = por %p120_p13, %p119_p12 }
  0x26   :  { %p122_p1 = pnand %p121_p0, %p115_p11 }
  0xae   :  { %v39_v3 = vpop.xlane.xlu0 %38 }
  0xaf   :  { %v40_v5 = vmul.f32 0.00390625, %v39_v3 }
  0xb1   :  { %v44_v7 = vmul.f32 %v43_v4, %v40_v5 }
  0xb3   :  { %v46_v8 = vadd.f32 %v45_v6, %v44_v7 }
  0xb5   :  { %v74_v9 = vmul.f32 -1.442695, %v46_v8 }
  0xb7   :  { %78 = vpow2.f32 %v74_v9 }
  0xc1   :  { %v79_v10 = vpop.eup %78 }
  0xc2   :  { %v50_v11 = vadd.f32 1.0, %v79_v10 }
  0xc4   :  { %80 = vrcp.f32 %v50_v11 }
  0xce   :  { %v81_v12 = vpop.eup %80 }
  0xcf   :  { %v53_v13 = vmul.f32 %v81_v12, %v35_v0  ;;  %v54_v14 = vmul.f32 %v81_v12, %v36_v1 }
  0xd1   :  { %55 = vst [vmem:[#allocation7] sm:$0xff] %v53_v13  ;;  %56 = vst [vmem:[#allocation7 + $0x8] sm:$0xff] %v54_v14 }
  0xd2   :  { %125 = shalt.err (!%p122_p1)
}
  0xd3   :  { %s126_s8 = scalar_lea.hbm %s198_s2, 256 }
  0xd4   :  { %p127_p2 = scmp.ne.s32.totalorder %s198_s2, %s126_s8  ;;  %p130_p3 = scmp.lt.u32.totalorder %s126_s8, %s198_s2 }
  0xd6   :  { %p132_p4 = pnand %p130_p3, %p127_p2 }
  0xd8   :  { %135 = shalt.err (!%p132_p4)
}
  0xd9   :  { %66 = dma.vmem_to_hbm [thread:$0]  %s64_s4, 256, %s198_s2, [#allocation4]  }
  0xda   :  { %140 = dma.done.wait [#allocation4], 256  }
  0xdb   :  { %141 = vsyncadd [#allocation4], 4294967040 }
  0xdc   :  { %70 = vsyncpa [#allocation3], 1 }
  0xdd   :  { %71 = vsyncpa [#allocation4], 1 }
  0xde   :  { %72 = vsyncpa [#allocation5], 1 }

</bundles_post_ra>
